<compile_context>
chip_gen: v7x
topology: tpu7x:2x2x1
jax: 0.10.0
libtpu: 0.0.40
codegen_flags: <defaults>
</compile_context>

<pallas_src>
import functools

import numpy as np
import jax
import jax.numpy as jnp
from jax.experimental import pallas as pl
from jax.experimental.pallas import tpu as pltpu

BN_EPS = 1e-5
LANE = 128


def _round_up(n, m):
    return (n + m - 1) // m * m


def _row_masks(L):
    row = jax.lax.broadcasted_iota(jnp.int32, (L, 1), 0)
    return row == 0, row == L - 1


def _conv3(h, w, first_row, last_row):
    """k=3, padding=1 conv along axis 0 of one (L, Ci) slab.

    h         : (L, Ci) f32
    w         : (3, Ci, Co) bf16; w[k] multiplies the x[l-1+k] tap
    first_row : (L, 1) bool, True at l == 0     (x[l-1] tap invalid)
    last_row  : (L, 1) bool, True at l == L-1   (x[l+1] tap invalid)
    returns   : (L, Co) f32
    """
    L, Ci = h.shape
    h_prev = jnp.where(first_row, 0.0, pltpu.roll(h, shift=1, axis=0))
    h_next = jnp.where(last_row, 0.0, pltpu.roll(h, shift=L - 1, axis=0))
    if Ci % LANE == 0:
        # Lane-dense channels: folding taps into K just abuts full vregs.
        taps = jnp.concatenate(
            [h_prev.astype(jnp.bfloat16), h.astype(jnp.bfloat16),
             h_next.astype(jnp.bfloat16)], axis=1)                  # (L, 3*Ci) bf16
        return jnp.dot(taps, w.reshape(3 * Ci, -1),
                       preferred_element_type=jnp.float32)
    # Sub-128-lane channels: skip the concat (avoids lane repacking) and push
    # three accumulating matmuls into one f32 accumulator.
    out = jnp.dot(h_prev.astype(jnp.bfloat16), w[0], preferred_element_type=jnp.float32)
    out += jnp.dot(h.astype(jnp.bfloat16), w[1], preferred_element_type=jnp.float32)
    out += jnp.dot(h_next.astype(jnp.bfloat16), w[2], preferred_element_type=jnp.float32)
    return out


def _bn_scale_shift(sum_v, sumsq_v, gamma, beta, inv_n):
    mean = sum_v * inv_n
    var = jnp.maximum(sumsq_v * inv_n - mean * mean, 0.0)   # guard cancellation
    scale = jax.lax.rsqrt(var + BN_EPS) * gamma
    shift = beta - mean * scale
    return scale, shift


# ---- Pass 1: conv1 + per-channel sum / sumsq -------------------------------
def _conv1_stats_kernel(x_ref, w1_ref, y1_ref, sum_ref, sumsq_ref):
    @pl.when(pl.program_id(0) == 0)
    def _():
        sum_ref[...] = jnp.zeros_like(sum_ref)
        sumsq_ref[...] = jnp.zeros_like(sumsq_ref)

    first_row, last_row = _row_masks(x_ref.shape[1])
    y = _conv3(x_ref[0], w1_ref[...], first_row, last_row)          # (L, Hp) f32
    y1_ref[0] = y
    sum_ref[...] += jnp.sum(y, axis=0, keepdims=True)
    sumsq_ref[...] += jnp.sum(y * y, axis=0, keepdims=True)


# ---- Pass 2: bn1 + relu + conv2 + per-channel sum / sumsq ------------------
def _bn1_conv2_stats_kernel(y1_ref, sum1_ref, sumsq1_ref, g1_ref, bt1_ref, w2_ref,
                            y2_ref, sum_ref, sumsq_ref, *, inv_n):
    @pl.when(pl.program_id(0) == 0)
    def _():
        sum_ref[...] = jnp.zeros_like(sum_ref)
        sumsq_ref[...] = jnp.zeros_like(sumsq_ref)

    scale, shift = _bn_scale_shift(sum1_ref[...], sumsq1_ref[...],
                                   g1_ref[...], bt1_ref[...], inv_n)
    h = jnp.maximum(y1_ref[0] * scale + shift, 0.0)                 # (L, Hp) f32
    first_row, last_row = _row_masks(h.shape[0])
    y = _conv3(h, w2_ref[...], first_row, last_row)
    y2_ref[0] = y
    sum_ref[...] += jnp.sum(y, axis=0, keepdims=True)
    sumsq_ref[...] += jnp.sum(y * y, axis=0, keepdims=True)


# ---- Pass 3: bn2 + relu + adaptive average pool ----------------------------
def _bn2_pool_kernel(y2_ref, sum2_ref, sumsq2_ref, g2_ref, bt2_ref, pool_ref,
                     o_ref, *, inv_n):
    scale, shift = _bn_scale_shift(sum2_ref[...], sumsq2_ref[...],
                                   g2_ref[...], bt2_ref[...], inv_n)
    h = jnp.maximum(y2_ref[0] * scale + shift, 0.0)                 # (L, Hp) f32
    # Tiny per-batch pool matmul kept in f32 to keep averages accurate.
    o_ref[0] = jnp.dot(pool_ref[...], h, preferred_element_type=jnp.float32)


def _adaptive_avg_pool_matrix(L, P):
    # exact AdaptiveAvgPool1d: start = floor(i*L/P), end = ceil((i+1)*L/P)
    M = np.zeros((P, L), np.float32)
    for i in range(P):
        start = (i * L) // P
        end = -((-(i + 1) * L) // P)
        M[i, start:end] = 1.0 / float(end - start)
    return M


def scale_encoder(x, params, pool_size):
    """x: (B, L, Cin) f32 -> (B, pool_size, H), matching ScaleEncoder.forward."""
    B, L, Cin = x.shape
    H = params["w1"].shape[0]                    # torch conv weight: (Co, Ci, K)
    Hp = _round_up(H, LANE)                      # lane-dense hidden channels
    P = pool_size
    inv_n = 1.0 / float(B * L)                   # BN stats over (batch, length)

    # Conv weights -> (K, Ci, Co_padded) bf16.  Conv biases are dropped: a
    # per-channel constant before training-mode BN is cancelled by the mean.
    w1 = jnp.transpose(params["w1"], (2, 1, 0))                            # (3, Cin, H)
    w1 = jnp.pad(w1, ((0, 0), (0, 0), (0, Hp - H))).astype(jnp.bfloat16)
    w2 = jnp.transpose(params["w2"], (2, 1, 0))                            # (3, H, H)
    w2 = jnp.pad(w2, ((0, 0), (0, Hp - H), (0, Hp - H))).astype(jnp.bfloat16)

    def pad_vec(v):  # (H,) -> (1, Hp); padded gamma/beta are 0 so padded lanes stay 0
        return jnp.pad(v, (0, Hp - H)).reshape(1, Hp).astype(jnp.float32)

    g1, bt1 = pad_vec(params["g1"]), pad_vec(params["beta1"])
    g2, bt2 = pad_vec(params["g2"]), pad_vec(params["beta2"])

    pool_mat = jnp.asarray(_adaptive_avg_pool_matrix(L, P))                # (P, L) f32
    x = x.astype(jnp.float32)

    vec = pl.BlockSpec((1, Hp), lambda b: (0, 0))                          # VMEM-resident
    slab_in = pl.BlockSpec((1, L, Cin), lambda b: (b, 0, 0))
    slab_h = pl.BlockSpec((1, L, Hp), lambda b: (b, 0, 0))
    stat_shape = jax.ShapeDtypeStruct((1, Hp), jnp.float32)

    # Stats accumulate across the batch axis -> sequential ("arbitrary").
    # TODO(synk): for very long sequences also tile L (1-row halo via overlapping
    # index_map), raise vmem_limit_bytes, and on v7x mark a row axis "parallel"
    # with per-core stat partials merged afterwards.
    seq_params = pltpu.CompilerParams(dimension_semantics=("arbitrary",))

    # Pass 1: conv1 + stats.
    y1, s1, ss1 = pl.pallas_call(
        _conv1_stats_kernel,
        grid=(B,),
        in_specs=[slab_in, pl.BlockSpec((3, Cin, Hp), lambda b: (0, 0, 0))],
        out_specs=(slab_h, vec, vec),
        out_shape=(jax.ShapeDtypeStruct((B, L, Hp), jnp.float32), stat_shape, stat_shape),
        compiler_params=seq_params,
    )(x, w1)

    # Pass 2: bn1 + relu + conv2 + stats.
    y2, s2, ss2 = pl.pallas_call(
        functools.partial(_bn1_conv2_stats_kernel, inv_n=inv_n),
        grid=(B,),
        in_specs=[slab_h, vec, vec, vec, vec,
                  pl.BlockSpec((3, Hp, Hp), lambda b: (0, 0, 0))],
        out_specs=(slab_h, vec, vec),
        out_shape=(jax.ShapeDtypeStruct((B, L, Hp), jnp.float32), stat_shape, stat_shape),
        compiler_params=seq_params,
    )(y1, s1, ss1, g1, bt1, w2)

    # Pass 3: bn2 + relu + pool (independent per batch -> megacore-parallel).
    out = pl.pallas_call(
        functools.partial(_bn2_pool_kernel, inv_n=inv_n),
        grid=(B,),
        in_specs=[slab_h, vec, vec, vec, vec,
                  pl.BlockSpec((P, L), lambda b: (0, 0))],
        out_specs=pl.BlockSpec((1, P, Hp), lambda b: (b, 0, 0)),
        out_shape=jax.ShapeDtypeStruct((B, P, Hp), jnp.float32),
        compiler_params=pltpu.CompilerParams(dimension_semantics=("parallel",)),
    )(y2, s2, ss2, g2, bt2, pool_mat)

    return out[:, :, :H]


def reference(x, params, pool_size):
    """Pure-JAX f32 reference mirroring the PyTorch forward (training-mode BN)."""
    def conv(xa, w, b):                          # xa (B,L,Ci), w (Co,Ci,3)
        L = xa.shape[1]
        xp = jnp.pad(xa, ((0, 0), (1, 1), (0, 0)))
        out = b[None, None, :]
        for k in range(3):
            out = out + jnp.einsum('blc,oc->blo', xp[:, k:k + L, :], w[:, :, k])
        return out

    def bn_relu(xa, g, beta):
        mean = xa.mean(axis=(0, 1), keepdims=True)
        var = ((xa - mean) ** 2).mean(axis=(0, 1), keepdims=True)
        return jnp.maximum((xa - mean) / jnp.sqrt(var + BN_EPS) * g + beta, 0.0)

    h = bn_relu(conv(x, params["w1"], params["b1"]), params["g1"], params["beta1"])
    h = bn_relu(conv(h, params["w2"], params["b2"]), params["g2"], params["beta2"])
    Pm = jnp.asarray(_adaptive_avg_pool_matrix(x.shape[1], pool_size))
    return jnp.einsum('pl,blc->bpc', Pm, h)


if __name__ == "__main__":
    B, L, Cin, H, P = 2, 16, 4, 32, 4

    ks = jax.random.split(jax.random.PRNGKey(0), 9)
    params = {
        "w1": 0.1 * jax.random.normal(ks[0], (H, Cin, 3), jnp.float32),
        "b1": 0.1 * jax.random.normal(ks[1], (H,), jnp.float32),
        "g1": 1.0 + 0.1 * jax.random.normal(ks[2], (H,), jnp.float32),
        "beta1": 0.1 * jax.random.normal(ks[3], (H,), jnp.float32),
        "w2": 0.1 * jax.random.normal(ks[4], (H, H, 3), jnp.float32),
        "b2": 0.1 * jax.random.normal(ks[5], (H,), jnp.float32),
        "g2": 1.0 + 0.05 * jax.random.normal(ks[6], (H,), jnp.float32),
        "beta2": 0.1 * jax.random.normal(ks[7], (H,), jnp.float32),
    }
    x = jax.random.normal(ks[8], (B, L, Cin), jnp.float32)

    out = jax.block_until_ready(scale_encoder(x, params, P))
    ref = reference(x, params, P)

    assert out.shape == (B, P, H)
    # Tolerance covers bf16 MXU conv operands (f32 accumulation, f32 BN stats/pool).
    if not np.allclose(np.asarray(out), np.asarray(ref), rtol=2e-2, atol=2e-2):
        raise AssertionError("Pallas kernel output does not match JAX reference")
    print("KERNEL_OK")
</pallas_src>

<mosaic_0001>
module attributes {stable_mosaic.version = 11 : i64} {
  func.func @_conv1_stats_kernel(%arg0: i32, %arg1: memref<1x16x4xf32, #tpu.memory_space<vmem>>, %arg2: memref<3x4x128xbf16, #tpu.memory_space<vmem>>, %arg3: memref<1x16x128xf32, #tpu.memory_space<vmem>>, %arg4: memref<1x128xf32, #tpu.memory_space<vmem>>, %arg5: memref<1x128xf32, #tpu.memory_space<vmem>>) attributes {dimension_semantics = [#tpu.dimension_semantics<arbitrary>], iteration_bounds = array<i64: 2>, scalar_prefetch = 0 : i64, scratch_operands = 0 : i64, tpu.core_type = #tpu.core_type<tc>, window_params = [{transform_indices = @transform_0, window_bounds = array<i64: 1, 16, 4>}, {pipeline_mode = #tpu.pipeline_mode<synchronous>, transform_indices = @transform_1, window_bounds = array<i64: 3, 4, 128>}, {transform_indices = @transform_2, window_bounds = array<i64: 1, 16, 128>}, {pipeline_mode = #tpu.pipeline_mode<synchronous>, transform_indices = @transform_3, window_bounds = array<i64: 1, 128>}, {pipeline_mode = #tpu.pipeline_mode<synchronous>, transform_indices = @transform_4, window_bounds = array<i64: 1, 128>}]} {
    %c0_i32 = arith.constant 0 : i32
    %0 = arith.cmpi eq, %arg0, %c0_i32 : i32
    %1 = arith.extui %0 : i1 to i32
    %c0_i32_0 = arith.constant 0 : i32
    %2 = arith.cmpi ne, %1, %c0_i32_0 : i32
    scf.if %2 {
      %cst_25 = arith.constant 0.000000e+00 : f32
      %49 = vector.broadcast %cst_25 : f32 to vector<1x128xf32>
      %c0_26 = arith.constant 0 : index
      %c0_27 = arith.constant 0 : index
      %50 = vector.load %arg4[%c0_26, %c0_27] : memref<1x128xf32, #tpu.memory_space<vmem>>, vector<1x128xf32>
      tpu.vector_store %arg4[%c0_26, %c0_27], %49 {strides = array<i32>} : memref<1x128xf32, #tpu.memory_space<vmem>>, vector<1x128xf32>,
      %cst_28 = arith.constant 0.000000e+00 : f32
      %51 = vector.broadcast %cst_28 : f32 to vector<1x128xf32>
      %c0_29 = arith.constant 0 : index
      %c0_30 = arith.constant 0 : index
      %52 = vector.load %arg5[%c0_29, %c0_30] : memref<1x128xf32, #tpu.memory_space<vmem>>, vector<1x128xf32>
      tpu.vector_store %arg5[%c0_29, %c0_30], %51 {strides = array<i32>} : memref<1x128xf32, #tpu.memory_space<vmem>>, vector<1x128xf32>,
    } else {
    }
    %3 = tpu.iota {dimensions = array<i32: 0>} : vector<16x1xi32>
    %c0_i32_1 = arith.constant 0 : i32
    %4 = vector.broadcast %c0_i32_1 : i32 to vector<16x1xi32>
    %5 = arith.cmpi eq, %3, %4 : vector<16x1xi32>
    %c15_i32 = arith.constant 15 : i32
    %6 = vector.broadcast %c15_i32 : i32 to vector<16x1xi32>
    %7 = arith.cmpi eq, %3, %6 : vector<16x1xi32>
    %c0 = arith.constant 0 : index
    %c0_2 = arith.constant 0 : index
    %c0_3 = arith.constant 0 : index
    %8 = vector.load %arg1[%c0, %c0_2, %c0_3] : memref<1x16x4xf32, #tpu.memory_space<vmem>>, vector<1x16x4xf32>
    %9 = vector.shape_cast %8 : vector<1x16x4xf32> to vector<16x4xf32>
    %c0_4 = arith.constant 0 : index
    %c0_5 = arith.constant 0 : index
    %c0_6 = arith.constant 0 : index
    %10 = vector.load %arg2[%c0_4, %c0_5, %c0_6] : memref<3x4x128xbf16, #tpu.memory_space<vmem>>, vector<3x4x128xbf16>
    %c1_i32 = arith.constant 1 : i32
    %11 = tpu.dynamic_rotate %9 by %c1_i32 dim 0 : vector<16x4xf32>, i32 -> vector<16x4xf32>
    %cst = arith.constant 0.000000e+00 : f32
    %12 = vector.shape_cast %5 : vector<16x1xi1> to vector<16x1xi1>
    %13 = vector.broadcast %12 : vector<16x1xi1> to vector<16x4xi1>
    %14 = vector.broadcast %cst : f32 to vector<16x4xf32>
    %15 = arith.select %13, %14, %11 : vector<16x4xi1>, vector<16x4xf32>
    %c15_i32_7 = arith.constant 15 : i32
    %16 = tpu.dynamic_rotate %9 by %c15_i32_7 dim 0 : vector<16x4xf32>, i32 -> vector<16x4xf32>
    %cst_8 = arith.constant 0.000000e+00 : f32
    %17 = vector.shape_cast %7 : vector<16x1xi1> to vector<16x1xi1>
    %18 = vector.broadcast %17 : vector<16x1xi1> to vector<16x4xi1>
    %19 = vector.broadcast %cst_8 : f32 to vector<16x4xf32>
    %20 = arith.select %18, %19, %16 : vector<16x4xi1>, vector<16x4xf32>
    %21 = arith.truncf %15 : vector<16x4xf32> to vector<16x4xbf16>
    %22 = vector.extract_strided_slice %10 {offsets = [0, 0, 0], sizes = [1, 4, 128], strides = [1, 1, 1]} : vector<3x4x128xbf16> to vector<1x4x128xbf16>
    %23 = vector.shape_cast %22 : vector<1x4x128xbf16> to vector<4x128xbf16>
    %cst_9 = arith.constant dense<0.000000e+00> : vector<16x128xf32>
    %24 = tpu.matmul %21, %23, %cst_9 {dimension_numbers = #tpu.dot_dimension_numbers<[1], [0], [0], [1], [0, 0, 1, 1], [], []>} : vector<16x4xbf16>, vector<4x128xbf16>, vector<16x128xf32> -> vector<16x128xf32>
    %25 = arith.truncf %9 : vector<16x4xf32> to vector<16x4xbf16>
    %26 = vector.extract_strided_slice %10 {offsets = [1, 0, 0], sizes = [1, 4, 128], strides = [1, 1, 1]} : vector<3x4x128xbf16> to vector<1x4x128xbf16>
    %27 = vector.shape_cast %26 : vector<1x4x128xbf16> to vector<4x128xbf16>
    %cst_10 = arith.constant dense<0.000000e+00> : vector<16x128xf32>
    %28 = tpu.matmul %25, %27, %cst_10 {dimension_numbers = #tpu.dot_dimension_numbers<[1], [0], [0], [1], [0, 0, 1, 1], [], []>} : vector<16x4xbf16>, vector<4x128xbf16>, vector<16x128xf32> -> vector<16x128xf32>
    %29 = arith.addf %24, %28 : vector<16x128xf32>
    %30 = arith.truncf %20 : vector<16x4xf32> to vector<16x4xbf16>
    %31 = vector.extract_strided_slice %10 {offsets = [2, 0, 0], sizes = [1, 4, 128], strides = [1, 1, 1]} : vector<3x4x128xbf16> to vector<1x4x128xbf16>
    %32 = vector.shape_cast %31 : vector<1x4x128xbf16> to vector<4x128xbf16>
    %cst_11 = arith.constant dense<0.000000e+00> : vector<16x128xf32>
    %33 = tpu.matmul %30, %32, %cst_11 {dimension_numbers = #tpu.dot_dimension_numbers<[1], [0], [0], [1], [0, 0, 1, 1], [], []>} : vector<16x4xbf16>, vector<4x128xbf16>, vector<16x128xf32> -> vector<16x128xf32>
    %34 = arith.addf %29, %33 : vector<16x128xf32>
    %c0_12 = arith.constant 0 : index
    %c0_13 = arith.constant 0 : index
    %c0_14 = arith.constant 0 : index
    %35 = vector.load %arg3[%c0_12, %c0_13, %c0_14] : memref<1x16x128xf32, #tpu.memory_space<vmem>>, vector<1x16x128xf32>
    %36 = vector.shape_cast %35 : vector<1x16x128xf32> to vector<16x128xf32>
    %37 = vector.shape_cast %34 : vector<16x128xf32> to vector<1x16x128xf32>
    tpu.vector_store %arg3[%c0_12, %c0_13, %c0_14], %37 {strides = array<i32>} : memref<1x16x128xf32, #tpu.memory_space<vmem>>, vector<1x16x128xf32>,
    %c0_15 = arith.constant 0 : index
    %c0_16 = arith.constant 0 : index
    %38 = vector.load %arg4[%c0_15, %c0_16] : memref<1x128xf32, #tpu.memory_space<vmem>>, vector<1x128xf32>
    %cst_17 = arith.constant dense<0.000000e+00> : vector<128xf32>
    %39 = vector.multi_reduction <add>, %34, %cst_17 [0] : vector<16x128xf32> to vector<128xf32>
    %40 = vector.shape_cast %39 : vector<128xf32> to vector<1x128xf32>
    %41 = arith.addf %38, %40 : vector<1x128xf32>
    %c0_18 = arith.constant 0 : index
    %c0_19 = arith.constant 0 : index
    %42 = vector.load %arg4[%c0_18, %c0_19] : memref<1x128xf32, #tpu.memory_space<vmem>>, vector<1x128xf32>
    tpu.vector_store %arg4[%c0_18, %c0_19], %41 {strides = array<i32>} : memref<1x128xf32, #tpu.memory_space<vmem>>, vector<1x128xf32>,
    %c0_20 = arith.constant 0 : index
    %c0_21 = arith.constant 0 : index
    %43 = vector.load %arg5[%c0_20, %c0_21] : memref<1x128xf32, #tpu.memory_space<vmem>>, vector<1x128xf32>
    %44 = arith.mulf %34, %34 : vector<16x128xf32>
    %cst_22 = arith.constant dense<0.000000e+00> : vector<128xf32>
    %45 = vector.multi_reduction <add>, %44, %cst_22 [0] : vector<16x128xf32> to vector<128xf32>
    %46 = vector.shape_cast %45 : vector<128xf32> to vector<1x128xf32>
    %47 = arith.addf %43, %46 : vector<1x128xf32>
    %c0_23 = arith.constant 0 : index
    %c0_24 = arith.constant 0 : index
    %48 = vector.load %arg5[%c0_23, %c0_24] : memref<1x128xf32, #tpu.memory_space<vmem>>, vector<1x128xf32>
    tpu.vector_store %arg5[%c0_23, %c0_24], %47 {strides = array<i32>} : memref<1x128xf32, #tpu.memory_space<vmem>>, vector<1x128xf32>,
    return
  }
  func.func @transform_0(%arg0: i32) -> (i32, i32, i32) {
    %c0_i32 = arith.constant 0 : i32
    %c0_i32_0 = arith.constant 0 : i32
    %c0_i32_1 = arith.constant 0 : i32
    return %arg0, %c0_i32, %c0_i32_0 : i32, i32, i32
  }
  func.func @transform_1(%arg0: i32) -> (i32, i32, i32) {
    %c0_i32 = arith.constant 0 : i32
    %c0_i32_0 = arith.constant 0 : i32
    %c0_i32_1 = arith.constant 0 : i32
    %c0_i32_2 = arith.constant 0 : i32
    return %c0_i32, %c0_i32_0, %c0_i32_1 : i32, i32, i32
  }
  func.func @transform_2(%arg0: i32) -> (i32, i32, i32) {
    %c0_i32 = arith.constant 0 : i32
    %c0_i32_0 = arith.constant 0 : i32
    %c0_i32_1 = arith.constant 0 : i32
    return %arg0, %c0_i32, %c0_i32_0 : i32, i32, i32
  }
  func.func @transform_3(%arg0: i32) -> (i32, i32) {
    %c0_i32 = arith.constant 0 : i32
    %c0_i32_0 = arith.constant 0 : i32
    %c0_i32_1 = arith.constant 0 : i32
    return %c0_i32, %c0_i32_0 : i32, i32
  }
  func.func @transform_4(%arg0: i32) -> (i32, i32) {
    %c0_i32 = arith.constant 0 : i32
    %c0_i32_0 = arith.constant 0 : i32
    %c0_i32_1 = arith.constant 0 : i32
    return %c0_i32, %c0_i32_0 : i32, i32
  }
}

</mosaic_0001>

<bundles_post_ra>
// kernel: tpu_custom_call.1
= control target key start
LH: loop header
LB: loop body
LE: loop exit
PB: predicated region body
PF: predicated region fallthrough
CT: control target
= control target key end

     0   :  { %10 = vsyncpa [#allocation3], 0  ;;  %s968_s0 = inlined_call_operand.vmem [shape: f32[2,16,4], index: 0, kind: input, shape index: {}]   ;;  %s969_s1 = inlined_call_operand.vmem [shape: bf16[3,4,128], index: 1, kind: input, shape index: {}]   ;;  %s970_s2 = inlined_call_operand.hbm [shape: f32[2,16,128], index: 2, kind: output, shape index: {0}]   ;;  %s971_s3 = inlined_call_operand.hbm [shape: f32[1,128], index: 3, kind: output, shape index: {1}]   ;;  %s972_s4 = inlined_call_operand.hbm [shape: f32[1,128], index: 4, kind: output, shape index: {2}]  }
   0x1   :  { %12 = vsyncpa [#allocation3 + $0x1], 0 }
   0x2   :  { %13 = vsyncpa [#allocation5], 0  ;;  %s787_s15 = smov 0   ;;  %s789_s16 = smov 0  }
   0x3   :  { %s791_s17 = smov 0   ;;  %s793_s18 = smov 0  }
   0x4 LB: > { %s808_s19 = sadd.s32 4294967295, %s752_s18   ;;  %s524_s20 = sadd.s32 4294967294, %s752_s18   ;;  %s752_s18 = sphi %s793_s18, %s978_s18   ;;  %s748_s17 = sphi %s791_s17, %s977_s17   ;;  %s744_s16 = sphi %s789_s16, %s976_s16   ;;  %s740_s15 = sphi %s787_s15, %s975_s15  }
   0x5   : > { %s812_s21 = sadd.s32 1, %s752_s18   ;;  %s73_s22 = sadd.s32 1, %s748_s17 }
   0x6   : > { %s70_s23 = ssub.s32 %s752_s18, %s812_s21  ;;  %p83_p0 = scmp.ne.s32.totalorder %s748_s17, %s744_s16 }
   0x7   : > { %p71_p1 = scmp.eq.s32.totalorder %s70_s23, 0  ;;  %p84_p2 = scmp.eq.s32.totalorder %s808_s19, 1 }
   0x8   : > { %p89_p3 = scmp.ne.s32.totalorder %s744_s16, %s740_s15  ;;  %p90_p4 = scmp.eq.s32.totalorder %s524_s20, 1 }
   0x9   : > { %s823_s24 = scalar_select %p71_p1, %s748_s17, %s73_s22  }
   0xa   : > { %p827_p5 = por %p84_p2, %p83_p0  ;;  %p831_p6 = por %p90_p4, %p89_p3 }
   0xb   : > { %p527_p7 = scmp.ge.s32.totalorder %s752_s18, 1  ;;  %p161_p8 = scmp.lt.s32.totalorder %s752_s18, 3 }
   0xd   : > { %p162_p9 = pnand %p527_p7, %p161_p8 }
   0xe   : > { %s180_s27 = sand.u32 (!%p162_p9), 1, %s744_s16   ;;  %p187_p10 = scmp.lt.s32.totalorder (!%p162_p9), %s808_s19, 1 }
   0xf   : > { %165 = sbr.rel (%p162_p9) target bundleno = 330 (0x14a), region = 28  ;;  %s528_s28 = sshll.u32 (!%p162_p9), %s180_s27, 4 }
  0x10   : > { %s845_s8 = scalar_lea.vmem (!%p162_p9), [#allocation2], %s528_s28  ;;  %p531_p11 = scmp.ne.s32.totalorder (!%p162_p9), %s808_s19, 0 }
  0x16   : > { %s188_s29 = scalar_select %p187_p10, %s808_s19, 1 }
  0x17   : > { %196 = sbr.rel (%p531_p11) target bundleno = 30 (0x1e), region = 32  ;;  %v754_v0 = vmov (!%p531_p11), 0.0  }
  0x18   : > { %s544_s30 = sshll.u32 %s188_s29, 4  ;;  %197 = vst [vmem:[#allocation4] sm:$0x1] (!%p531_p11), %v754_v0  ;;  %198 = vst [vmem:[#allocation6] sm:$0x1] (!%p531_p11), %v754_v0 }
  0x19   : > { %s191_s7 = scalar_lea.vmem %s968_s0, %s544_s30 }
  0x1e PF: > { %v208_v1 = vld [vmem:[%s969_s1] sm:$0x3]  ;;  %vm239_vm0 = vcmask 1041408   ;;  %v199_v2 = vlaneseq  ;;  %v755_v4 = vmov 0.0   ;;  %vm756_vm1 = vmmov 0   ;;  %v207_v6 = vld [vmem:[%s191_s7 + $0x8] sm:$0xff] }
  0x1f   : > { %v206_v3 = vld [vmem:[%s191_s7] sm:$0xff]  ;;  %558 = vmatprep.subr.bf16.mxu0 %v755_v4  ;;  %v288_v5 = vsel %vm239_vm0, %v208_v1, 0  ;;  %560 = vmatprep.mubr.msk.bf16.mxu0 %vm756_vm1, %v755_v4  ;;  %v212_v9 = vrot.slane %v207_v6, 7  ;;  %vm235_vm4 = vcmask 31744   ;;  %v223_v21 = vrot.slane %v207_v6, 1  ;;  %s545_s20 = sshll.u32 %s808_s19, 8 }
  0x20   : > { %v211_v7 = vrot.slane %v206_v3, 7  ;;  %559 = vmatpush3.bf16.msra.mxu0 %v288_v5  ;;  %v200_v8 = vshrl.u32 %v199_v2, 7  ;;  %552 = vmatprep.subr.bf16.mxu1 %v755_v4  ;;  %v209_v10 = vld [vmem:[%s969_s1 + $0x2] sm:$0x3]  ;;  %v210_v11 = vld [vmem:[%s969_s1 + $0x4] sm:$0x3]  ;;  %v234_v13 = vpack.c.bf16 %v207_v6, %v206_v3  ;;  %s871_s29 = scalar_lea.hbm %s970_s2, %s545_s20 }
  0x21   : > { %564 = vmatprep.subr.bf16.mxu0 %v755_v4  ;;  %v241_v12 = vsel %vm239_vm0, %v209_v10, 0  ;;  %554 = vmatprep.mubr.msk.bf16.mxu1 %vm756_vm1, %v755_v4  ;;  %v336_v17 = vsel %vm239_vm0, %v210_v11, 0  ;;  %v222_v20 = vrot.slane %v206_v3, 1  ;;  %s419_s22 = sshll.u32 %s845_s8, 4  ;;  %s879_s30 = scalar_lea.sflag [#allocation3], %s180_s27  ;;  %s873_s22 = int_to_ptr.vmem [resolvable:$true] %s419_s22 }
  0x22   : > { %vm202_vm2 = vcmp.eq.s32.totalorder %v200_v8, 0  ;;  %vm213_vm3 = vcmp.lt.s32.totalorder %v200_v8, 1  ;;  %553 = vmatpush3.bf16.msra.mxu1 %v241_v12  ;;  %v201_v19 = vadd.s32 8, %v200_v8  ;;  %vm224_vm5 = vcmp.lt.s32.totalorder %v200_v8, 7  ;;  %s634_s5 = scalar_lea.vmem %s873_s22, 256  ;;  %s757_s6 = smov [#allocation2]  }
  0x23   : > { %v214_v14 = vsel %vm213_vm3, %v211_v7, %v212_v9  ;;  %v215_v15 = vsel %vm213_vm3, %v212_v9, %v211_v7  ;;  %v226_v22 = vsel %vm224_vm5, %v223_v21, %v222_v20  ;;  %v225_v23 = vsel %vm224_vm5, %v222_v20, %v223_v21  ;;  %p635_p12 = scmp.ne.s32.totalorder %s873_s22, %s634_s5  ;;  %s638_s7 = sshll.u32 %s757_s6, 4  ;;  %s639_s7 = int_to_ptr.vmem [resolvable:$false] %s638_s7 }
  0x24   : > { %v220_v16 = vsel %vm202_vm2, 0.0, %v215_v15  ;;  %vm205_vm6 = vcmp.eq.s32.totalorder %v201_v19, 15  ;;  %s640_s9 = scalar_lea.vmem %s639_s7, 512  ;;  %p641_p1 = scmp.lt.s32.totalorder %s873_s22, %s639_s7 }
  0x25   : > { %v233_v18 = vpack.c.bf16 %v214_v14, %v220_v16  ;;  %555 = vmatmul.mubr.msk.bf16.vlgmr.msra.gmra.mrb[0].mxu1 %vm235_vm4, %v234_v13  ;;  %v232_v24 = vsel %vm205_vm6, 0.0, %v226_v22  ;;  %p636_p13 = pnand %p635_p12, %p827_p5  ;;  %p642_p3 = scmp.lt.s32.totalorder %s640_s9, %s634_s5 }
  0x26   : > { %v331_v25 = vpack.c.bf16 %v232_v24, %v225_v23 }
  0x27   : > { %561 = vmatmul.mubr.msk.bf16.vlgmr.msra.gmra.mrb[0].mxu0 %vm235_vm4, %v233_v18  ;;  %p637_p0 = pneg %p636_p13  ;;  %p643_p4 = por %p642_p3, %p641_p1 }
  0x28   : > { %565 = vmatpush3.bf16.msra.mxu0 %v336_v17  ;;  %566 = vmatprep.mubr.msk.bf16.mxu0 %vm756_vm1, %v755_v4 }
  0x29   : > { %p644_p7 = pnand %p643_p4, %p637_p0 }
  0x33   : > { %567 = vmatmul.mubr.msk.bf16.vlgmr.msra.gmra.mrb[0].mxu0 %vm235_vm4, %v331_v25 }
  0xf8   : > { %v277_v26 = vpop.f32.mrb[0].mxu1 }
  0xf9   : > { %v556_v27 = vpop.f32.mrb[1].mxu1 }
  0xfa   : > { %v280_v28 = vpop.f32.mrb[2].mxu1 }
  0xfb   : > { %v557_v29 = vpop.f32.mrb[3].mxu1 }
 0x106   : > { %v372_v30 = vpop.f32.mrb[0].mxu0 }
 0x107   : > { %v570_v31 = vadd.f32 %v372_v30, %v277_v26  ;;  %v568_v32 = vpop.f32.mrb[1].mxu0 }
 0x108   : > { %v375_v33 = vpop.f32.mrb[2].mxu0 }
 0x109   : > { %381 = vst [vmem:[%s845_s8] sm:$0xff] %v570_v31  ;;  %v571_v34 = vadd.f32 %v375_v33, %v280_v28  ;;  %v569_v35 = vpop.f32.mrb[3].mxu0  ;;  %v394_v36 = vmul.f32 %v570_v31, %v570_v31 }
 0x10b   : > { %382 = vst [vmem:[%s845_s8 + $0x8] sm:$0xff] %v571_v34  ;;  %v384_v37 = vadd.f32 %v571_v34, %v570_v31  ;;  %v395_v38 = vmul.f32 %v571_v34, %v571_v34 }
 0x10c   : > { %647 = shalt.err (!%p644_p7)
}
 0x10d   : > { %s648_s27 = scalar_lea.hbm %s871_s29, 256  ;;  %s652_s11 = scalar_lea.hbm %s970_s2, 512 }
 0x10e   : > { %p649_p8 = scmp.ne.s32.totalorder %s871_s29, %s648_s27  ;;  %p653_p11 = scmp.lt.u32.totalorder %s871_s29, %s970_s2 }
 0x10f   : > { %p654_p12 = scmp.lt.u32.totalorder %s652_s11, %s648_s27  ;;  %p656_p0 = scmp.lt.u32.totalorder %s648_s27, %s871_s29 }
 0x110   : > { %p650_p9 = pnand %p649_p8, %p827_p5 }
 0x111   : > { %p655_p13 = por %p654_p12, %p653_p11 }
 0x112   : > { %p651_p10 = pneg %p650_p9 }
 0x113   : > { %p657_p1 = por %p656_p0, %p655_p13 }
 0x115   : > { %p658_p3 = pnand %p657_p1, %p651_p10 }
 0x117   : > { %661 = shalt.err (!%p658_p3)
}
 0x118   : > { %s758_s14 = smov 128   ;;  %s759_s20 = smov 8   ;;  %v385_v39 = vrot.slane %v384_v37, 4  ;;  %v396_v40 = vadd.f32 %v395_v38, %v394_v36  ;;  %v383_v49 = vld [vmem:[#allocation4] sm:$0x1] }
 0x119   : > { %576 = dma.vmem_to_hbm [thread:$0]  (%p827_p5), %s873_s22, 256, %s871_s29, %s879_s30, %s758_s14, %s758_s14, %s759_s20   ;;  %v393_v52 = vld [vmem:[#allocation6] sm:$0x1] }
 0x11a   : > { %v386_v41 = vadd.f32 %v385_v39, %v384_v37  ;;  %v397_v42 = vrot.slane %v396_v40, 4  ;;  %s760_s23 = smov [#allocation4]   ;;  %s761_s5 = smov [#allocation6]  }
 0x11b   : > { %s433_s28 = sshll.u32 %s760_s23, 4  ;;  %s444_s25 = sshll.u32 %s761_s5, 4  ;;  %s434_s28 = int_to_ptr.vmem [resolvable:$true] %s433_s28  ;;  %s903_s25 = int_to_ptr.vmem [resolvable:$true] %s444_s25 }
 0x11c   : > { %v398_v43 = vadd.f32 %v397_v42, %v396_v40  ;;  %v387_v44 = vrot.slane %v386_v41, 2  ;;  %s662_s22 = scalar_lea.vmem %s434_s28, 16  ;;  %s668_s29 = scalar_lea.vmem %s434_s28, 32 }
 0x11d   : > { %p663_p5 = scmp.ne.s32.totalorder %s434_s28, %s662_s22  ;;  %p669_p8 = scmp.lt.s32.totalorder %s434_s28, %s434_s28 }
 0x11e   : > { %v388_v45 = vadd.f32 %v387_v44, %v386_v41  ;;  %v399_v46 = vrot.slane %v398_v43, 2  ;;  %p670_p9 = scmp.lt.s32.totalorder %s668_s29, %s662_s22 }
 0x11f   : > { %p664_p4 = pnand %p663_p5, %p84_p2 }
 0x120   : > { %v389_v47 = vrot.slane %v388_v45, 1  ;;  %v400_v48 = vadd.f32 %v399_v46, %v398_v43  ;;  %p671_p10 = por %p670_p9, %p669_p8 }
 0x121   : > { %p665_p7 = pneg %p664_p4 }
 0x122   : > { %v390_v50 = vadd.f32 %v389_v47, %v388_v45  ;;  %v401_v51 = vrot.slane %v400_v48, 1 }
 0x123   : > { %p672_p11 = pnand %p671_p10, %p665_p7 }
 0x124   : > { %v391_v53 = vadd.f32 %v390_v50, %v383_v49  ;;  %v402_v54 = vadd.f32 %v401_v51, %v400_v48 }
 0x126   : > { %392 = vst [vmem:[#allocation4] sm:$0x1] %v391_v53  ;;  %v403_v55 = vadd.f32 %v402_v54, %v393_v52 }
 0x127   : > { %675 = shalt.err (!%p672_p11)
}
 0x128   : > { %s676_s7 = scalar_lea.hbm %s971_s3, 16 }
 0x129   : > { %p677_p12 = scmp.ne.s32.totalorder %s971_s3, %s676_s7  ;;  %p682_p1 = scmp.lt.u32.totalorder %s676_s7, %s971_s3 }
 0x12b   : > { %p678_p13 = pnand %p677_p12, %p84_p2 }
 0x12d   : > { %p679_p0 = pneg %p678_p13 }
 0x12f   : > { %p684_p3 = pnand %p682_p1, %p679_p0 }
 0x131   : > { %687 = shalt.err (!%p684_p3)
}
 0x132   : > { %578 = dma.vmem_to_hbm [thread:$0]  (%p84_p2), %s434_s28, 16, %s971_s3, [#allocation5]   ;;  %404 = vst [vmem:[#allocation6] sm:$0x1] %v403_v55 }
 0x133   : > { %s688_s13 = scalar_lea.vmem %s903_s25, 16  ;;  %s694_s14 = scalar_lea.vmem %s903_s25, 32 }
 0x134   : > { %p689_p5 = scmp.ne.s32.totalorder %s903_s25, %s688_s13  ;;  %p695_p8 = scmp.lt.s32.totalorder %s903_s25, %s903_s25 }
 0x135   : > { %p696_p9 = scmp.lt.s32.totalorder %s694_s14, %s688_s13 }
 0x136   : > { %p690_p4 = pnand %p689_p5, %p84_p2 }
 0x137   : > { %p697_p10 = por %p696_p9, %p695_p8 }
 0x138   : > { %p691_p7 = pneg %p690_p4 }
 0x13a   : > { %p698_p11 = pnand %p697_p10, %p691_p7 }
 0x13c   : > { %701 = shalt.err (!%p698_p11)
}
 0x13d   : > { %s702_s5 = scalar_lea.hbm %s972_s4, 16 }
 0x13e   : > { %p703_p12 = scmp.ne.s32.totalorder %s972_s4, %s702_s5  ;;  %p708_p1 = scmp.lt.u32.totalorder %s702_s5, %s972_s4 }
 0x140   : > { %p704_p13 = pnand %p703_p12, %p84_p2 }
 0x142   : > { %p705_p0 = pneg %p704_p13 }
 0x144   : > { %p710_p3 = pnand %p708_p1, %p705_p0 }
 0x146   : > { %713 = shalt.err (!%p710_p3)
}
 0x147   : > { %580 = dma.vmem_to_hbm [thread:$0]  (%p84_p2), %s903_s25, 16, %s972_s4, [#allocation5]  }
 0x148   : > { %731 = dma.done.wait (%p84_p2), [#allocation5], 32  }
 0x149   : > { %733 = vsyncadd (%p84_p2), [#allocation5], 4294967264 }
 0x14a PF: > { %p594_p5 = scmp.ge.s32.totalorder %s752_s18, 2  ;;  %s464_s9 = sand.u32 1, %s740_s15  }
 0x14b   : > { %s465_s27 = scalar_lea.sflag [#allocation3], %s464_s9 }
 0x14c   : > { %p587_p4 = pnand %p594_p5, %p831_p6 }
 0x14e   : > { %735 = dma.done.wait (!%p587_p4), %s465_s27, 256  }
 0x14f   : > { %737 = vsyncadd (!%p587_p4), %s465_s27, 4294967040  ;;  %p16_p7 = scmp.ge.s32.totalorder %s812_s21, 4   ;;  %s975_s15 = smov %s744_s16 }
 0x150   : > { %s976_s16 = smov %s748_s17  ;;  %s977_s17 = smov %s823_s24 }
 0x151   : > { %s978_s18 = smov %s812_s21  ;;  %18 = sbr.rel (!%p16_p7) target bundleno = 4 (0x4), region = 83 }
 0x158   :  { %470 = vsyncpa [#allocation3], 1 }
 0x159   :  { %472 = vsyncpa [#allocation3 + $0x1], 1 }
 0x15a   :  { %473 = vsyncpa [#allocation5], 1 }

</bundles_post_ra>
